<compile_context>
chip_gen: v7x
topology: tpu7x:2x2x1
jax: 0.10.0
libtpu: 0.0.40
codegen_flags: <defaults>
</compile_context>

<pallas_src>
import functools

import jax
import jax.numpy as jnp
from jax.experimental import pallas as pl
from jax.experimental.pallas import tpu as pltpu

EPS = 1e-5
NEG_SLOPE = 0.01          # F.leaky_relu default
C1, K1 = 20, 3            # conv1: Conv1d(1, 20, kernel_size=3)
C2, K2 = 40, 2            # conv2: Conv1d(20, 40, kernel_size=2)
HID = 180                 # fc1 output features


def _round_up(n, m):
    return -(-n // m) * m


def _slab_layout(L, L1, L2):
    """Static row offsets of each section inside the packed parameter slab.
    Every section starts at an 8-row (sublane tile) aligned offset, lane 0."""
    F1, F2 = L1 * C1, L2 * C2
    offs = {}
    row = 0

    def take(name, nrows):
        nonlocal row
        offs[name] = row
        row += _round_up(nrows, 8)

    take("w1", L)       # (L,  F1)  banded conv1 weight
    take("w2", F1)      # (F1, F2)  banded block-Toeplitz conv2 weight
    take("wf1", F2)     # (F2, HID) fc1 weight (feature order matched to kernel)
    take("wf2", HID)    # (HID, apad) fc2 weight, lane-padded
    take("r1", F1)      # (F1, C1)  position->channel reduce selector
    take("e1", C1)      # (C1, F1)  channel->position expand selector
    take("r2", F2)      # (F2, C2)
    take("e2", C2)      # (C2, F2)
    take("vec", 8)      # 8 bias / BN-parameter rows
    return offs, row


def dqn_kernel(x_ref, p_ref, o_ref, *, L, L1, L2):
    """x: (B, L) input rows.  p: packed parameter slab.  o: (B, apad) logits."""
    F1, F2 = L1 * C1, L2 * C2
    apad = o_ref.shape[1]
    B = x_ref.shape[0]
    off, _ = _slab_layout(L, L1, L2)

    def leaky(v):
        return jnp.maximum(v, NEG_SLOPE * v)

    x = x_ref[...]                                                    # (B, L)

    # ---- packed parameter slab slices (static, tile-aligned offsets) ----
    W1 = p_ref[off["w1"]:off["w1"] + L, 0:F1]                          # (L, F1)
    W2 = p_ref[off["w2"]:off["w2"] + F1, 0:F2]                         # (F1, F2)
    Wf1 = p_ref[off["wf1"]:off["wf1"] + F2, 0:HID]                     # (F2, HID)
    Wf2 = p_ref[off["wf2"]:off["wf2"] + HID, 0:apad]                   # (HID, apad)
    R1 = p_ref[off["r1"]:off["r1"] + F1, 0:C1]                         # (F1, C1)
    E1 = p_ref[off["e1"]:off["e1"] + C1, 0:F1]                         # (C1, F1)
    R2 = p_ref[off["r2"]:off["r2"] + F2, 0:C2]                         # (F2, C2)
    E2 = p_ref[off["e2"]:off["e2"] + C2, 0:F2]                         # (C2, F2)
    vec = p_ref[off["vec"]:off["vec"] + 8, :]                          # (8, width)
    b1f, g1, bt1 = vec[0:1, 0:F1], vec[1:2, 0:C1], vec[2:3, 0:C1]
    b2f, g2, bt2 = vec[3:4, 0:F2], vec[4:5, 0:C2], vec[5:6, 0:C2]
    bf1, bf2 = vec[6:7, 0:HID], vec[7:8, 0:apad]

    # ---- conv1: one matmul against the banded (L, L1*C1) weight ----
    a1 = jnp.dot(x, W1, preferred_element_type=jnp.float32) + b1f      # (B, F1)

    # ---- BN1: training-mode batch stats (centered variance), folded ----
    inv_n1 = 1.0 / float(B * L1)
    m1c = jnp.dot(jnp.sum(a1, axis=0, keepdims=True), R1,
                  preferred_element_type=jnp.float32) * inv_n1          # (1, C1)
    m1f = jnp.dot(m1c, E1, preferred_element_type=jnp.float32)          # (1, F1)
    d1 = a1 - m1f
    v1c = jnp.dot(jnp.sum(d1 * d1, axis=0, keepdims=True), R1,
                  preferred_element_type=jnp.float32) * inv_n1          # (1, C1)
    sc1 = g1 * jax.lax.rsqrt(v1c + EPS)
    sh1 = bt1 - m1c * sc1
    sc1f = jnp.dot(sc1, E1, preferred_element_type=jnp.float32)         # (1, F1)
    sh1f = jnp.dot(sh1, E1, preferred_element_type=jnp.float32)
    y1 = leaky(a1 * sc1f + sh1f)                                        # (B, F1)

    # ---- conv2: one matmul against the banded block-Toeplitz weight ----
    z2 = jnp.dot(y1, W2, preferred_element_type=jnp.float32) + b2f      # (B, F2)

    # ---- BN2 ----
    inv_n2 = 1.0 / float(B * L2)
    m2c = jnp.dot(jnp.sum(z2, axis=0, keepdims=True), R2,
                  preferred_element_type=jnp.float32) * inv_n2
    m2f = jnp.dot(m2c, E2, preferred_element_type=jnp.float32)
    d2 = z2 - m2f
    v2c = jnp.dot(jnp.sum(d2 * d2, axis=0, keepdims=True), R2,
                  preferred_element_type=jnp.float32) * inv_n2
    sc2 = g2 * jax.lax.rsqrt(v2c + EPS)
    sh2 = bt2 - m2c * sc2
    sc2f = jnp.dot(sc2, E2, preferred_element_type=jnp.float32)
    sh2f = jnp.dot(sh2, E2, preferred_element_type=jnp.float32)
    y2 = leaky(z2 * sc2f + sh2f)                                        # (B, F2)

    # ---- fc1 / fc2: y2 is already the flattened feature row per batch ----
    h1 = leaky(jnp.dot(y2, Wf1, preferred_element_type=jnp.float32) + bf1)
    h2 = jnp.dot(h1, Wf2, preferred_element_type=jnp.float32) + bf2
    o_ref[...] = leaky(h2)                                              # lane-dense store


@functools.partial(jax.jit, static_argnames=("apad",))
def _dqn_forward_padded(x2d, slab, *, apad):
    B, L = x2d.shape
    L1 = L - K1 + 1
    L2 = L1 - K2 + 1
    _, nrows = _slab_layout(L, L1, L2)
    if slab.shape[0] != nrows:
        raise ValueError("parameter slab does not match this input length")
    vmem = pl.BlockSpec(memory_space=pltpu.MemorySpace.VMEM)
    return pl.pallas_call(
        functools.partial(dqn_kernel, L=L, L1=L1, L2=L2),
        out_shape=jax.ShapeDtypeStruct((B, apad), jnp.float32),
        in_specs=[vmem, vmem],
        out_specs=vmem,
    )(x2d, slab)


def dqn_forward(x, params):
    """Forward pass.  Returns the lane-padded (B, apad) logits; slice
    [:, :num_action] lazily at the consumer (keeps the hot path free of an
    extra XLA slice/copy)."""
    assert params["num_action"] <= params["apad"]
    B = x.shape[0]
    L = x.shape[-1]
    assert L == params["input_length"], "params were packed for a different input length"
    x2d = x.reshape(B, L).astype(jnp.float32)
    return _dqn_forward_padded(x2d, params["slab"], apad=params["apad"])


def init_torch_params(key, input_length, num_action):
    """PyTorch-shaped parameters with PyTorch-style uniform(-1/sqrt(fan_in), ...) init."""
    L1 = input_length - K1 + 1
    L2 = L1 - K2 + 1
    flat = C2 * L2
    ks = jax.random.split(key, 8)

    def unif(k, shape, fan_in):
        b = 1.0 / float(fan_in) ** 0.5
        return jax.random.uniform(k, shape, jnp.float32, -b, b)

    return dict(
        w1=unif(ks[0], (C1, 1, K1), 1 * K1), b1=unif(ks[1], (C1,), 1 * K1),
        g1=jnp.ones((C1,), jnp.float32), bt1=jnp.zeros((C1,), jnp.float32),
        w2=unif(ks[2], (C2, C1, K2), C1 * K2), b2=unif(ks[3], (C2,), C1 * K2),
        g2=jnp.ones((C2,), jnp.float32), bt2=jnp.zeros((C2,), jnp.float32),
        wf1=unif(ks[4], (HID, flat), flat), bf1=unif(ks[5], (HID,), flat),
        wf2=unif(ks[6], (num_action, HID), HID), bf2=unif(ks[7], (num_action,), HID),
    )


def pack_params(tp, input_length, num_action):
    """Convert PyTorch-shaped params into ONE lane-padded kernel slab."""
    L = input_length
    L1 = L - K1 + 1
    L2 = L1 - K2 + 1
    F1, F2 = L1 * C1, L2 * C2
    apad = _round_up(num_action, 128)
    width = _round_up(max(F1, F2, HID, apad), 128)

    # Banded conv1 weight: W1[p, l*C1 + c] = w1[c, 0, p - l] for 0 <= p-l < K1.
    W1 = jnp.zeros((L, F1), jnp.float32)
    for l in range(L1):
        for k in range(K1):
            W1 = W1.at[l + k, l * C1:(l + 1) * C1].set(tp["w1"][:, 0, k])

    # Banded block-Toeplitz conv2 weight:
    # W2[(j+k)*C1 + i, j*C2 + o] = w2[o, i, k].
    W2 = jnp.zeros((F1, F2), jnp.float32)
    for j in range(L2):
        for k in range(K2):
            W2 = W2.at[(j + k) * C1:(j + k + 1) * C1,
                       j * C2:(j + 1) * C2].set(jnp.transpose(tp["w2"][:, :, k]))

    # fc1: kernel features are (position, channel)-major; PyTorch flattens (channel, position).
    Wf1 = jnp.transpose(tp["wf1"].reshape(HID, C2, L2), (2, 1, 0)).reshape(F2, HID)
    Wf2 = jnp.zeros((HID, apad), jnp.float32).at[:, :num_action].set(jnp.transpose(tp["wf2"]))

    # BN reduce (positions -> channel) and expand (channel -> positions) selector matrices.
    R1 = jnp.tile(jnp.eye(C1, dtype=jnp.float32), (L1, 1))     # (F1, C1)
    R2 = jnp.tile(jnp.eye(C2, dtype=jnp.float32), (L2, 1))     # (F2, C2)

    offs, nrows = _slab_layout(L, L1, L2)
    slab = jnp.zeros((nrows, width), jnp.float32)

    def put(s, arr, row):
        r, c = arr.shape
        return s.at[row:row + r, 0:c].set(arr.astype(jnp.float32))

    slab = put(slab, W1, offs["w1"])
    slab = put(slab, W2, offs["w2"])
    slab = put(slab, Wf1, offs["wf1"])
    slab = put(slab, Wf2, offs["wf2"])
    slab = put(slab, R1, offs["r1"])
    slab = put(slab, jnp.transpose(R1), offs["e1"])
    slab = put(slab, R2, offs["r2"])
    slab = put(slab, jnp.transpose(R2), offs["e2"])

    v = offs["vec"]
    slab = put(slab, jnp.tile(tp["b1"][None, :], (1, L1)), v + 0)   # conv1 bias, per-lane
    slab = put(slab, tp["g1"][None, :], v + 1)
    slab = put(slab, tp["bt1"][None, :], v + 2)
    slab = put(slab, jnp.tile(tp["b2"][None, :], (1, L2)), v + 3)   # conv2 bias, per-lane
    slab = put(slab, tp["g2"][None, :], v + 4)
    slab = put(slab, tp["bt2"][None, :], v + 5)
    slab = put(slab, tp["bf1"][None, :], v + 6)
    slab = put(slab, jnp.zeros((1, apad), jnp.float32).at[0, :num_action].set(tp["bf2"]), v + 7)

    return dict(slab=slab, num_action=num_action, apad=apad, input_length=input_length)


def reference_forward(x, tp):
    """Pure-JAX re-implementation of the PyTorch forward (NCL layout, training-mode BN)."""
    B = x.shape[0]
    L = x.shape[-1]
    L1 = L - K1 + 1
    L2 = L1 - K2 + 1
    xin = x.reshape(B, 1, L).astype(jnp.float32)

    def leaky(v):
        return jnp.where(v > 0, v, NEG_SLOPE * v)

    def bn(z, g, b):                                      # z: (B, C, L'), batch stats
        m = jnp.mean(z, axis=(0, 2), keepdims=True)
        v = jnp.mean((z - m) ** 2, axis=(0, 2), keepdims=True)
        return (z - m) / jnp.sqrt(v + EPS) * g[None, :, None] + b[None, :, None]

    z1 = tp["b1"][None, :, None] + sum(
        xin[:, 0, k:k + L1][:, None, :] * tp["w1"][None, :, 0, k, None] for k in range(K1))
    y1 = leaky(bn(z1, tp["g1"], tp["bt1"]))               # (B, C1, L1)
    z2 = tp["b2"][None, :, None] + sum(
        jnp.einsum("bil,oi->bol", y1[:, :, k:k + L2], tp["w2"][:, :, k]) for k in range(K2))
    y2 = leaky(bn(z2, tp["g2"], tp["bt2"]))               # (B, C2, L2)
    feat = y2.reshape(B, C2 * L2)                         # PyTorch (c, l)-order flatten
    h1 = leaky(feat @ tp["wf1"].T + tp["bf1"])
    h2 = leaky(h1 @ tp["wf2"].T + tp["bf2"])
    return h2


if __name__ == "__main__":
    input_length = 6       # docstring: "Input 6x6"
    num_action = 10
    batch = 4

    key = jax.random.PRNGKey(0)
    kx, kp = jax.random.split(key)
    x = jax.random.normal(kx, (batch, 1, input_length), jnp.float32)

    tp = init_torch_params(kp, input_length, num_action)
    params = pack_params(tp, input_length, num_action)

    out_pad = dqn_forward(x, params)
    jax.block_until_ready(out_pad)
    assert out_pad.shape == (batch, params["apad"])
    out = out_pad[:, :num_action]          # lazy lane slice at the consumer

    ref = reference_forward(x, tp)
    assert bool(jnp.all(jnp.isfinite(out)))
    err = float(jnp.max(jnp.abs(out - ref)))
    assert err < 2e-2, f"kernel/reference mismatch: max abs err {err}"
    print("KERNEL_OK")
</pallas_src>

<mosaic_0001>
module attributes {stable_mosaic.version = 11 : i64} {
  func.func @dqn_kernel(%arg0: memref<4x6xf32, #tpu.memory_space<vmem>>, %arg1: memref<664x256xf32, #tpu.memory_space<vmem>>, %arg2: memref<4x128xf32, #tpu.memory_space<vmem>>) attributes {dimension_semantics = [], scalar_prefetch = 0 : i64, scratch_operands = 0 : i64, tpu.core_type = #tpu.core_type<tc>} {
    %c0 = arith.constant 0 : index
    %c0_0 = arith.constant 0 : index
    %0 = vector.load %arg0[%c0, %c0_0] : memref<4x6xf32, #tpu.memory_space<vmem>>, vector<4x6xf32>
    %c0_1 = arith.constant 0 : index
    %c0_2 = arith.constant 0 : index
    %1 = vector.load %arg1[%c0_1, %c0_2] : memref<664x256xf32, #tpu.memory_space<vmem>>, vector<6x80xf32>
    %c8 = arith.constant 8 : index
    %c0_3 = arith.constant 0 : index
    %2 = vector.load %arg1[%c8, %c0_3] : memref<664x256xf32, #tpu.memory_space<vmem>>, vector<80x120xf32>
    %c88 = arith.constant 88 : index
    %c0_4 = arith.constant 0 : index
    %3 = vector.load %arg1[%c88, %c0_4] : memref<664x256xf32, #tpu.memory_space<vmem>>, vector<120x180xf32>
    %c208 = arith.constant 208 : index
    %c0_5 = arith.constant 0 : index
    %4 = vector.load %arg1[%c208, %c0_5] : memref<664x256xf32, #tpu.memory_space<vmem>>, vector<180x128xf32>
    %c392 = arith.constant 392 : index
    %c0_6 = arith.constant 0 : index
    %5 = vector.load %arg1[%c392, %c0_6] : memref<664x256xf32, #tpu.memory_space<vmem>>, vector<80x20xf32>
    %c472 = arith.constant 472 : index
    %c0_7 = arith.constant 0 : index
    %6 = vector.load %arg1[%c472, %c0_7] : memref<664x256xf32, #tpu.memory_space<vmem>>, vector<20x80xf32>
    %c496 = arith.constant 496 : index
    %c0_8 = arith.constant 0 : index
    %7 = vector.load %arg1[%c496, %c0_8] : memref<664x256xf32, #tpu.memory_space<vmem>>, vector<120x40xf32>
    %c616 = arith.constant 616 : index
    %c0_9 = arith.constant 0 : index
    %8 = vector.load %arg1[%c616, %c0_9] : memref<664x256xf32, #tpu.memory_space<vmem>>, vector<40x120xf32>
    %c656 = arith.constant 656 : index
    %c0_10 = arith.constant 0 : index
    %9 = vector.load %arg1[%c656, %c0_10] : memref<664x256xf32, #tpu.memory_space<vmem>>, vector<8x256xf32>
    %10 = vector.extract_strided_slice %9 {offsets = [0, 0], sizes = [1, 80], strides = [1, 1]} : vector<8x256xf32> to vector<1x80xf32>
    %11 = vector.extract_strided_slice %9 {offsets = [1, 0], sizes = [1, 20], strides = [1, 1]} : vector<8x256xf32> to vector<1x20xf32>
    %12 = vector.extract_strided_slice %9 {offsets = [2, 0], sizes = [1, 20], strides = [1, 1]} : vector<8x256xf32> to vector<1x20xf32>
    %13 = vector.extract_strided_slice %9 {offsets = [3, 0], sizes = [1, 120], strides = [1, 1]} : vector<8x256xf32> to vector<1x120xf32>
    %14 = vector.extract_strided_slice %9 {offsets = [4, 0], sizes = [1, 40], strides = [1, 1]} : vector<8x256xf32> to vector<1x40xf32>
    %15 = vector.extract_strided_slice %9 {offsets = [5, 0], sizes = [1, 40], strides = [1, 1]} : vector<8x256xf32> to vector<1x40xf32>
    %16 = vector.extract_strided_slice %9 {offsets = [6, 0], sizes = [1, 180], strides = [1, 1]} : vector<8x256xf32> to vector<1x180xf32>
    %17 = vector.extract_strided_slice %9 {offsets = [7, 0], sizes = [1, 128], strides = [1, 1]} : vector<8x256xf32> to vector<1x128xf32>
    %cst = arith.constant dense<0.000000e+00> : vector<4x80xf32>
    %18 = tpu.matmul %0, %1, %cst {dimension_numbers = #tpu.dot_dimension_numbers<[1], [0], [0], [1], [0, 0, 1, 1], [], []>} : vector<4x6xf32>, vector<6x80xf32>, vector<4x80xf32> -> vector<4x80xf32>
    %19 = vector.broadcast %10 : vector<1x80xf32> to vector<4x80xf32>
    %20 = arith.addf %18, %19 : vector<4x80xf32>
    %cst_11 = arith.constant dense<0.000000e+00> : vector<80xf32>
    %21 = vector.multi_reduction <add>, %20, %cst_11 [0] : vector<4x80xf32> to vector<80xf32>
    %22 = vector.shape_cast %21 : vector<80xf32> to vector<1x80xf32>
    %cst_12 = arith.constant dense<0.000000e+00> : vector<1x20xf32>
    %23 = tpu.matmul %22, %5, %cst_12 {dimension_numbers = #tpu.dot_dimension_numbers<[1], [0], [0], [1], [0, 0, 1, 1], [], []>} : vector<1x80xf32>, vector<80x20xf32>, vector<1x20xf32> -> vector<1x20xf32>
    %cst_13 = arith.constant 6.250000e-02 : f32
    %24 = vector.broadcast %cst_13 : f32 to vector<1x20xf32>
    %25 = arith.mulf %23, %24 : vector<1x20xf32>
    %cst_14 = arith.constant dense<0.000000e+00> : vector<1x80xf32>
    %26 = tpu.matmul %25, %6, %cst_14 {dimension_numbers = #tpu.dot_dimension_numbers<[1], [0], [0], [1], [0, 0, 1, 1], [], []>} : vector<1x20xf32>, vector<20x80xf32>, vector<1x80xf32> -> vector<1x80xf32>
    %27 = vector.broadcast %26 : vector<1x80xf32> to vector<4x80xf32>
    %28 = arith.subf %20, %27 : vector<4x80xf32>
    %29 = arith.mulf %28, %28 : vector<4x80xf32>
    %cst_15 = arith.constant dense<0.000000e+00> : vector<80xf32>
    %30 = vector.multi_reduction <add>, %29, %cst_15 [0] : vector<4x80xf32> to vector<80xf32>
    %31 = vector.shape_cast %30 : vector<80xf32> to vector<1x80xf32>
    %cst_16 = arith.constant dense<0.000000e+00> : vector<1x20xf32>
    %32 = tpu.matmul %31, %5, %cst_16 {dimension_numbers = #tpu.dot_dimension_numbers<[1], [0], [0], [1], [0, 0, 1, 1], [], []>} : vector<1x80xf32>, vector<80x20xf32>, vector<1x20xf32> -> vector<1x20xf32>
    %cst_17 = arith.constant 6.250000e-02 : f32
    %33 = vector.broadcast %cst_17 : f32 to vector<1x20xf32>
    %34 = arith.mulf %32, %33 : vector<1x20xf32>
    %cst_18 = arith.constant 9.99999974E-6 : f32
    %35 = vector.broadcast %cst_18 : f32 to vector<1x20xf32>
    %36 = arith.addf %34, %35 : vector<1x20xf32>
    %37 = math.rsqrt %36 : vector<1x20xf32>
    %38 = arith.mulf %11, %37 : vector<1x20xf32>
    %39 = arith.mulf %25, %38 : vector<1x20xf32>
    %40 = arith.subf %12, %39 : vector<1x20xf32>
    %cst_19 = arith.constant dense<0.000000e+00> : vector<1x80xf32>
    %41 = tpu.matmul %38, %6, %cst_19 {dimension_numbers = #tpu.dot_dimension_numbers<[1], [0], [0], [1], [0, 0, 1, 1], [], []>} : vector<1x20xf32>, vector<20x80xf32>, vector<1x80xf32> -> vector<1x80xf32>
    %cst_20 = arith.constant dense<0.000000e+00> : vector<1x80xf32>
    %42 = tpu.matmul %40, %6, %cst_20 {dimension_numbers = #tpu.dot_dimension_numbers<[1], [0], [0], [1], [0, 0, 1, 1], [], []>} : vector<1x20xf32>, vector<20x80xf32>, vector<1x80xf32> -> vector<1x80xf32>
    %43 = vector.broadcast %41 : vector<1x80xf32> to vector<4x80xf32>
    %44 = arith.mulf %20, %43 : vector<4x80xf32>
    %45 = vector.broadcast %42 : vector<1x80xf32> to vector<4x80xf32>
    %46 = arith.addf %44, %45 : vector<4x80xf32>
    %cst_21 = arith.constant 0.00999999977 : f32
    %47 = vector.broadcast %cst_21 : f32 to vector<4x80xf32>
    %48 = arith.mulf %47, %46 : vector<4x80xf32>
    %49 = arith.maximumf %46, %48 : vector<4x80xf32>
    %cst_22 = arith.constant dense<0.000000e+00> : vector<4x120xf32>
    %50 = tpu.matmul %49, %2, %cst_22 {dimension_numbers = #tpu.dot_dimension_numbers<[1], [0], [0], [1], [0, 0, 1, 1], [], []>} : vector<4x80xf32>, vector<80x120xf32>, vector<4x120xf32> -> vector<4x120xf32>
    %51 = vector.broadcast %13 : vector<1x120xf32> to vector<4x120xf32>
    %52 = arith.addf %50, %51 : vector<4x120xf32>
    %cst_23 = arith.constant dense<0.000000e+00> : vector<120xf32>
    %53 = vector.multi_reduction <add>, %52, %cst_23 [0] : vector<4x120xf32> to vector<120xf32>
    %54 = vector.shape_cast %53 : vector<120xf32> to vector<1x120xf32>
    %cst_24 = arith.constant dense<0.000000e+00> : vector<1x40xf32>
    %55 = tpu.matmul %54, %7, %cst_24 {dimension_numbers = #tpu.dot_dimension_numbers<[1], [0], [0], [1], [0, 0, 1, 1], [], []>} : vector<1x120xf32>, vector<120x40xf32>, vector<1x40xf32> -> vector<1x40xf32>
    %cst_25 = arith.constant 0.0833333358 : f32
    %56 = vector.broadcast %cst_25 : f32 to vector<1x40xf32>
    %57 = arith.mulf %55, %56 : vector<1x40xf32>
    %cst_26 = arith.constant dense<0.000000e+00> : vector<1x120xf32>
    %58 = tpu.matmul %57, %8, %cst_26 {dimension_numbers = #tpu.dot_dimension_numbers<[1], [0], [0], [1], [0, 0, 1, 1], [], []>} : vector<1x40xf32>, vector<40x120xf32>, vector<1x120xf32> -> vector<1x120xf32>
    %59 = vector.broadcast %58 : vector<1x120xf32> to vector<4x120xf32>
    %60 = arith.subf %52, %59 : vector<4x120xf32>
    %61 = arith.mulf %60, %60 : vector<4x120xf32>
    %cst_27 = arith.constant dense<0.000000e+00> : vector<120xf32>
    %62 = vector.multi_reduction <add>, %61, %cst_27 [0] : vector<4x120xf32> to vector<120xf32>
    %63 = vector.shape_cast %62 : vector<120xf32> to vector<1x120xf32>
    %cst_28 = arith.constant dense<0.000000e+00> : vector<1x40xf32>
    %64 = tpu.matmul %63, %7, %cst_28 {dimension_numbers = #tpu.dot_dimension_numbers<[1], [0], [0], [1], [0, 0, 1, 1], [], []>} : vector<1x120xf32>, vector<120x40xf32>, vector<1x40xf32> -> vector<1x40xf32>
    %cst_29 = arith.constant 0.0833333358 : f32
    %65 = vector.broadcast %cst_29 : f32 to vector<1x40xf32>
    %66 = arith.mulf %64, %65 : vector<1x40xf32>
    %cst_30 = arith.constant 9.99999974E-6 : f32
    %67 = vector.broadcast %cst_30 : f32 to vector<1x40xf32>
    %68 = arith.addf %66, %67 : vector<1x40xf32>
    %69 = math.rsqrt %68 : vector<1x40xf32>
    %70 = arith.mulf %14, %69 : vector<1x40xf32>
    %71 = arith.mulf %57, %70 : vector<1x40xf32>
    %72 = arith.subf %15, %71 : vector<1x40xf32>
    %cst_31 = arith.constant dense<0.000000e+00> : vector<1x120xf32>
    %73 = tpu.matmul %70, %8, %cst_31 {dimension_numbers = #tpu.dot_dimension_numbers<[1], [0], [0], [1], [0, 0, 1, 1], [], []>} : vector<1x40xf32>, vector<40x120xf32>, vector<1x120xf32> -> vector<1x120xf32>
    %cst_32 = arith.constant dense<0.000000e+00> : vector<1x120xf32>
    %74 = tpu.matmul %72, %8, %cst_32 {dimension_numbers = #tpu.dot_dimension_numbers<[1], [0], [0], [1], [0, 0, 1, 1], [], []>} : vector<1x40xf32>, vector<40x120xf32>, vector<1x120xf32> -> vector<1x120xf32>
    %75 = vector.broadcast %73 : vector<1x120xf32> to vector<4x120xf32>
    %76 = arith.mulf %52, %75 : vector<4x120xf32>
    %77 = vector.broadcast %74 : vector<1x120xf32> to vector<4x120xf32>
    %78 = arith.addf %76, %77 : vector<4x120xf32>
    %cst_33 = arith.constant 0.00999999977 : f32
    %79 = vector.broadcast %cst_33 : f32 to vector<4x120xf32>
    %80 = arith.mulf %79, %78 : vector<4x120xf32>
    %81 = arith.maximumf %78, %80 : vector<4x120xf32>
    %cst_34 = arith.constant dense<0.000000e+00> : vector<4x180xf32>
    %82 = tpu.matmul %81, %3, %cst_34 {dimension_numbers = #tpu.dot_dimension_numbers<[1], [0], [0], [1], [0, 0, 1, 1], [], []>} : vector<4x120xf32>, vector<120x180xf32>, vector<4x180xf32> -> vector<4x180xf32>
    %83 = vector.broadcast %16 : vector<1x180xf32> to vector<4x180xf32>
    %84 = arith.addf %82, %83 : vector<4x180xf32>
    %cst_35 = arith.constant 0.00999999977 : f32
    %85 = vector.broadcast %cst_35 : f32 to vector<4x180xf32>
    %86 = arith.mulf %85, %84 : vector<4x180xf32>
    %87 = arith.maximumf %84, %86 : vector<4x180xf32>
    %cst_36 = arith.constant dense<0.000000e+00> : vector<4x128xf32>
    %88 = tpu.matmul %87, %4, %cst_36 {dimension_numbers = #tpu.dot_dimension_numbers<[1], [0], [0], [1], [0, 0, 1, 1], [], []>} : vector<4x180xf32>, vector<180x128xf32>, vector<4x128xf32> -> vector<4x128xf32>
    %89 = vector.broadcast %17 : vector<1x128xf32> to vector<4x128xf32>
    %90 = arith.addf %88, %89 : vector<4x128xf32>
    %cst_37 = arith.constant 0.00999999977 : f32
    %91 = vector.broadcast %cst_37 : f32 to vector<4x128xf32>
    %92 = arith.mulf %91, %90 : vector<4x128xf32>
    %93 = arith.maximumf %90, %92 : vector<4x128xf32>
    %c0_38 = arith.constant 0 : index
    %c0_39 = arith.constant 0 : index
    %94 = vector.load %arg2[%c0_38, %c0_39] : memref<4x128xf32, #tpu.memory_space<vmem>>, vector<4x128xf32>
    tpu.vector_store %arg2[%c0_38, %c0_39], %93 {strides = array<i32>} : memref<4x128xf32, #tpu.memory_space<vmem>>, vector<4x128xf32>,
    return
  }
}

</mosaic_0001>

<bundles_post_ra>
// kernel: _dqn_forward_padded.1
= control target key start
LH: loop header
LB: loop body
LE: loop exit
PB: predicated region body
PF: predicated region fallthrough
CT: control target
= control target key end

     0   :  { %7 = vsyncpa [#allocation3], 0  ;;  %s2110_s0 = inlined_call_operand.hbm [shape: f32[4,6], index: 0, kind: input, shape index: {}]   ;;  %s2111_s1 = inlined_call_operand.hbm [shape: f32[664,256], index: 1, kind: input, shape index: {}]   ;;  %s2112_s2 = inlined_call_operand.hbm [shape: f32[4,128], index: 2, kind: output, shape index: {}]  }
   0x1   :  { %8 = vsyncpa [#allocation6], 0 }
   0x2   :  { %9 = vsyncpa [#allocation4], 0  ;;  %s1900_s9 = smov [#allocation2]   ;;  %s1901_s11 = smov [#allocation5]  }
   0x3   :  { %s16_s10 = sshll.u32 %s1900_s9, 4  ;;  %s25_s12 = sshll.u32 %s1901_s11, 4  ;;  %s17_s10 = int_to_ptr.vmem [resolvable:$true] %s16_s10  ;;  %s1923_s12 = int_to_ptr.vmem [resolvable:$true] %s25_s12 }
   0x4   :  { %s1828_s15 = scalar_lea.hbm %s2110_s0, 64 }
   0x5   :  { %p1829_p0 = scmp.ne.s32.totalorder %s2110_s0, %s1828_s15  ;;  %p1832_p1 = scmp.lt.u32.totalorder %s1828_s15, %s2110_s0 }
   0x7   :  { %p1834_p2 = pnand %p1832_p1, %p1829_p0 }
   0x9   :  { %1837 = shalt.err (!%p1834_p2)
}
   0xa   :  { %s1838_s20 = scalar_lea.vmem %s17_s10, 64  ;;  %p1843_p4 = scmp.lt.s32.totalorder %s17_s10, %s17_s10 }
   0xb   :  { %p1839_p3 = scmp.ne.s32.totalorder %s17_s10, %s1838_s20  ;;  %p1844_p5 = scmp.lt.s32.totalorder %s1838_s20, %s1838_s20 }
   0xd   :  { %p1845_p6 = por %p1844_p5, %p1843_p4 }
   0xf   :  { %p1846_p7 = pnand %p1845_p6, %p1839_p3 }
  0x11   :  { %1849 = shalt.err (!%p1846_p7)
}
  0x12   :  { %19 = dma.hbm_to_vmem [thread:$0]  %s2110_s0, 64, %s17_s10, [#allocation3]  }
  0x13   :  { %s1850_s25 = scalar_lea.hbm %s2111_s1, 21248 }
  0x14   :  { %p1851_p8 = scmp.ne.s32.totalorder %s2111_s1, %s1850_s25  ;;  %p1854_p9 = scmp.lt.u32.totalorder %s1850_s25, %s2111_s1 }
  0x16   :  { %p1856_p10 = pnand %p1854_p9, %p1851_p8 }
  0x18   :  { %1859 = shalt.err (!%p1856_p10)
}
  0x19   :  { %s1860_s30 = scalar_lea.vmem %s1923_s12, 21248  ;;  %p1865_p12 = scmp.lt.s32.totalorder %s1923_s12, %s1923_s12 }
  0x1a   :  { %p1861_p11 = scmp.ne.s32.totalorder %s1923_s12, %s1860_s30  ;;  %p1866_p13 = scmp.lt.s32.totalorder %s1860_s30, %s1860_s30 }
  0x1c   :  { %p1867_p0 = por %p1866_p13, %p1865_p12 }
  0x1e   :  { %p1868_p1 = pnand %p1867_p0, %p1861_p11 }
  0x20   :  { %1871 = shalt.err (!%p1868_p1)
}
  0x21   :  { %s1902_s0 = smov 256   ;;  %s1903_s3 = smov 16  }
  0x22   :  { %31 = dma.hbm_to_vmem [thread:$0]  %s2111_s1, 21248, %s1923_s12, [#allocation6], %s1902_s0, %s1902_s0, %s1903_s3  }
  0x23   :  { %1894 = dma.done.wait [#allocation3], 64  }
  0x24   :  { %1895 = vsyncadd [#allocation3], 4294967232 }
  0x25   :  { %1896 = dma.done.wait [#allocation6], 21248  }
  0x26   :  { %1897 = vsyncadd [#allocation6], 4294946048  ;;  %v1904_v0 = vmov 0.0   ;;  %vm1905_vm0 = vmmov 0   ;;  %v1906_v1 = vmov 0.0|0.0   ;;  %vm146_vm1 = vcmask 1045504  }
  0x27   :  { %1435 = vmatprep.subr.mxu0 %v1904_v0  ;;  %1437 = vmatprep.mubr.msk.f32.mxu0 %vm1905_vm0, %v1904_v0  ;;  %vm142_vm2 = vcmask 48128   ;;  %v39_v2 = vld [vmem:[#allocation5] sm:$0x3f]  ;;  %v38_v3 = vld [vmem:[#allocation2] sm:$0xf]  ;;  %v103_v4 = vld [vmem:[#allocation5 + $0x310] sm:$0xff]  ;;  %v138_v22 = vlaneseq }
  0x28   :  { %1641 = vmatprep.subr.bf16.mxu1 %v1906_v1  ;;  %1460 = vmatprep.mubr.msk.f32.mxu1 %vm1905_vm0, %v1904_v0  ;;  %v104_v5 = vld [vmem:[#allocation5 + $0x320] sm:$0xff]  ;;  %v105_v7 = vld [vmem:[#allocation5 + $0x330] sm:$0xff]  ;;  %vm220_vm3 = vcmask 650240   ;;  %vm228_vm4 = vcmask 654336   ;;  %vm307_vm5 = vcmask 1043456   ;;  %vm303_vm6 = vcmask 162816  }
  0x29   :  { %1436 = vmatpush3.msk.msra.mxu0 %vm146_vm1, %v39_v2  ;;  %v1642_v6 = vpack.c.bf16 %v104_v5, %v103_v4  ;;  %v106_v8 = vld [vmem:[#allocation5 + $0x340] sm:$0xff]  ;;  %v107_v10 = vld [vmem:[#allocation5 + $0x350] sm:$0xff]  ;;  %v1972_v23 = vshrl.u32 %v138_v22, 7  ;;  %vm717_vm7 = vcmask 977920   ;;  %vm725_vm8 = vcmask 982016   ;;  %s1907_s1 = smov [#allocation7]  }
  0x2a   :  { %1438 = vmatmul.mubr.msk.f32.vlgmr.msra.gmra.mrb[0].mxu0 %vm142_vm2, %v38_v3  ;;  %1656 = vmatprep.subr.bf16.mxu0 %v1906_v1  ;;  %v1645_v9 = vpack.c.bf16 %v106_v8, %v105_v7  ;;  %v108_v11 = vld [vmem:[#allocation5 + $0x360] sm:$0xff]  ;;  %v109_v13 = vld [vmem:[#allocation5 + $0x370] sm:$0xff]  ;;  %vm800_vm9 = vcmask 326656   ;;  %vm1223_vm10 = vcmask 424960   ;;  %s1309_s6 = sshll.u32 %s1907_s1, 4  ;;  %s1310_s6 = int_to_ptr.vmem [resolvable:$true] %s1309_s6 }
  0x2b   :  { %1469 = vmatprep.mubr.msk.f32.mxu0 %vm1905_vm0, %v1904_v0  ;;  %1643 = vmatpush3.bf16.msra.mxu1 %v1642_v6  ;;  %v1648_v12 = vpack.c.bf16 %v108_v11, %v107_v10  ;;  %v110_v14 = vld [vmem:[#allocation5 + $0x380] sm:$0xff]  ;;  %v111_v16 = vld [vmem:[#allocation5 + $0x390] sm:$0xff]  ;;  %v1975_v24 = vsub.s32 0, %v1972_v23  ;;  %s1872_s7 = scalar_lea.vmem %s1310_s6, 64  ;;  %p1877_p3 = scmp.lt.s32.totalorder %s1310_s6, %s1310_s6 }
  0x2c   :  { %1644 = vmatprep.subr.bf16.mxu1 %v1906_v1  ;;  %v1651_v15 = vpack.c.bf16 %v110_v14, %v109_v13  ;;  %v112_v17 = vld [vmem:[#allocation5 + $0x3a0] sm:$0xff]  ;;  %v113_v19 = vld [vmem:[#allocation5 + $0x3b0] sm:$0xff]  ;;  %p1873_p2 = scmp.ne.s32.totalorder %s1310_s6, %s1872_s7  ;;  %p1878_p4 = scmp.lt.s32.totalorder %s1872_s7, %s1872_s7 }
  0x2d   :  { %v1654_v18 = vpack.c.bf16 %v112_v17, %v111_v16  ;;  %v114_v20 = vld [vmem:[#allocation5 + $0x3c0] sm:$0xff]  ;;  %v115_v37 = vld [vmem:[#allocation5 + $0x3d0] sm:$0xf] }
  0x2e   :  { %v1968_v21 = vpack.c.bf16 %v114_v20, %v113_v19  ;;  %v1977_v25 = vld [vmem:[#allocation5 + $0x520] sm:$0xff]  ;;  %v40_v53 = vld [vmem:[#allocation5 + $0x10] sm:$0xff]  ;;  %p1879_p5 = por %p1878_p4, %p1877_p3 }
  0x2f   :  { %1646 = vmatpush3.bf16.msra.mxu1 %v1645_v9  ;;  %v141_v26 = vrot.slane %v1977_v25, %v1975_v24  ;;  %v41_v54 = vld [vmem:[#allocation5 + $0x20] sm:$0xff]  ;;  %v117_v19 = vld [vmem:[#allocation5 + $0x3f0] sm:$0xff] }
  0x30   :  { %1647 = vmatprep.subr.bf16.mxu1 %v1906_v1  ;;  %1658 = vmatpush3.bf16.msra.mxu0 %v1968_v21  ;;  %v1681_v55 = vpack.c.bf16 %v41_v54, %v40_v53  ;;  %v43_v7 = vld [vmem:[#allocation5 + $0x40] sm:$0xff]  ;;  %v119_v22 = vld [vmem:[#allocation5 + $0x410] sm:$0xff]  ;;  %v642_v53 = vsub.s32 3, %v1972_v23  ;;  %p1880_p6 = pnand %p1879_p5, %p1873_p2 }
  0x31   :  { %1467 = vmatprep.subr.mxu0 %v1904_v0  ;;  %v45_v10 = vld [vmem:[#allocation5 + $0x60] sm:$0xff] }
  0x32   :  { %v47_v13 = vld [vmem:[#allocation5 + $0x80] sm:$0xff]  ;;  %v643_v54 = vrot.slane %v1977_v25, %v642_v53 }
  0x33   :  { %1649 = vmatpush3.bf16.msra.mxu1 %v1648_v12  ;;  %v49_v16 = vld [vmem:[#allocation5 + $0xa0] sm:$0xff] }
  0x34   :  { %1650 = vmatprep.subr.bf16.mxu1 %v1906_v1  ;;  %1468 = vmatpush3.msk.msra.mxu0 %vm307_vm5, %v115_v37  ;;  %v118_v20 = vld [vmem:[#allocation5 + $0x400] sm:$0xff] }
  0x35   :  { %1659 = vmatprep.subr.bf16.mxu0 %v1906_v1 }
  0x37   :  { %1652 = vmatpush3.bf16.msra.mxu1 %v1651_v15 }
  0x38   :  { %1653 = vmatprep.subr.bf16.mxu1 %v1906_v1 }
  0x3b   :  { %1655 = vmatpush3.bf16.msra.mxu1 %v1654_v18 }
  0x3c   :  { %1674 = vmatprep.subr.bf16.mxu1 %v1906_v1 }
  0xfd   :  { %v216_v27 = vpop.f32.mrb[0].mxu0 }
  0xfe   :  { %v1981_v28 = vadd.f32 %v216_v27, %v141_v26  ;;  %v1439_v29 = vpop.f32.mrb[1].mxu0  ;;  %v1699_v26 = vpack.c.bf16 %v119_v22, %v118_v20  ;;  %v120_v27 = vld [vmem:[#allocation5 + $0x420] sm:$0xff] }
  0xff   :  { %v121_v29 = vld [vmem:[#allocation5 + $0x430] sm:$0xff] }
 0x100   :  { %v221_v30 = vsel %vm220_vm3, %v1981_v28, 0.0 }
 0x101   :  { %v222_v31 = vrot.slane %v221_v30, 4 }
 0x103   :  { %v223_v32 = vadd.f32 %v222_v31, %v221_v30  ;;  %v1702_v30 = vpack.c.bf16 %v121_v29, %v120_v27  ;;  %v122_v31 = vld [vmem:[#allocation5 + $0x440] sm:$0xff] }
 0x105   :  { %v224_v33 = vrot.slane %v223_v32, 2 }
 0x107   :  { %v225_v34 = vadd.f32 %v224_v33, %v223_v32  ;;  %v123_v32 = vld [vmem:[#allocation5 + $0x450] sm:$0xff] }
 0x108   :  { %v1705_v33 = vpack.c.bf16 %v123_v32, %v122_v31 }
 0x109   :  { %v226_v35 = vrot.slane %v225_v34, 1 }
 0x10b   :  { %v227_v36 = vadd.f32 %v226_v35, %v225_v34 }
 0x10d   :  { %1461 = vmatmul.mubr.msk.f32.vlgmr.msra.gmra.mrb[0].mxu1 %vm228_vm4, %v227_v36 }
 0x10e   :  { %1676 = vmatpush3.bf16.msra.mxu1 %v1968_v21  ;;  %1501 = vmatprep.mubr.msk.f32.mxu1 %vm1905_vm0, %v1904_v0 }
 0x10f   :  { %1499 = vmatprep.subr.mxu1 %v1904_v0 }
 0x112   :  { %1500 = vmatpush3.msk.msra.mxu1 %vm307_vm5, %v115_v37 }
 0x113   :  { %1677 = vmatprep.subr.bf16.mxu1 %v1906_v1 }
 0x1e0   :  { %v298_v38 = vpop.f32.mrb[0].mxu1 }
 0x1e1   :  { %v302_v39 = vmul.f32 0.0625, %v298_v38  ;;  %v1462_v40 = vpop.f32.mrb[1].mxu1 }
 0x1e3   :  { %1470 = vmatmul.mubr.msk.f32.vlgmr.msra.gmra.mrb[2].mxu0 %vm303_vm6, %v302_v39 }
 0x1e4   :  { %1661 = vmatpush3.bf16.msra.mxu0 %v1642_v6  ;;  %1492 = vmatprep.mubr.msk.f32.mxu0 %vm1905_vm0, %v1904_v0  ;;  %v42_v6 = vld [vmem:[#allocation5 + $0x30] sm:$0xff] }
 0x1e5   :  { %1662 = vmatprep.subr.bf16.mxu0 %v1906_v1  ;;  %v1684_v8 = vpack.c.bf16 %v43_v7, %v42_v6  ;;  %v133_v6 = vld [vmem:[#allocation5 + $0x4f0] sm:$0xff]  ;;  %v134_v7 = vld [vmem:[#allocation5 + $0x500] sm:$0xff] }
 0x1e8   :  { %1664 = vmatpush3.bf16.msra.mxu0 %v1645_v9  ;;  %v44_v9 = vld [vmem:[#allocation5 + $0x50] sm:$0xff] }
 0x1e9   :  { %1665 = vmatprep.subr.bf16.mxu0 %v1906_v1  ;;  %v1687_v11 = vpack.c.bf16 %v45_v10, %v44_v9  ;;  %v135_v9 = vld [vmem:[#allocation5 + $0x510] sm:$0xff] }
 0x1ec   :  { %1667 = vmatpush3.bf16.msra.mxu0 %v1648_v12  ;;  %v46_v12 = vld [vmem:[#allocation5 + $0x70] sm:$0xff] }
 0x1ed   :  { %1668 = vmatprep.subr.bf16.mxu0 %v1906_v1  ;;  %v1690_v14 = vpack.c.bf16 %v47_v13, %v46_v12 }
 0x1f0   :  { %1670 = vmatpush3.bf16.msra.mxu0 %v1651_v15  ;;  %v48_v15 = vld [vmem:[#allocation5 + $0x90] sm:$0xff] }
 0x1f1   :  { %1671 = vmatprep.subr.bf16.mxu0 %v1906_v1  ;;  %v1693_v17 = vpack.c.bf16 %v49_v16, %v48_v15 }
 0x1f4   :  { %1673 = vmatpush3.bf16.msra.mxu0 %v1654_v18  ;;  %v116_v18 = vld [vmem:[#allocation5 + $0x3e0] sm:$0xff] }
 0x1f5   :  { %1680 = vmatprep.subr.bf16.mxu0 %v1906_v1 }
 0x2b6   :  { %v377_v41 = vpop.f32.mrb[2].mxu0 }
 0x2b7   :  { %v384_v42 = vrot.slane %v377_v41, %v1975_v24  ;;  %v1471_v43 = vpop.f32.mrb[3].mxu0 }
 0x2b9   :  { %v385_v44 = vsub.f32 %v1981_v28, %v384_v42 }
 0x2bb   :  { %v386_v45 = vmul.f32 %v385_v44, %v385_v44  ;;  %v125_v44 = vld [vmem:[#allocation5 + $0x470] sm:$0xff] }
 0x2bd   :  { %v387_v46 = vsel %vm220_vm3, %v386_v45, 0.0 }
 0x2be   :  { %v388_v47 = vrot.slane %v387_v46, 4 }
 0x2c0   :  { %v389_v48 = vadd.f32 %v388_v47, %v387_v46  ;;  %v126_v46 = vld [vmem:[#allocation5 + $0x480] sm:$0xff]  ;;  %v127_v47 = vld [vmem:[#allocation5 + $0x490] sm:$0xff] }
 0x2c2   :  { %v390_v49 = vrot.slane %v389_v48, 2 }
 0x2c4   :  { %v391_v50 = vadd.f32 %v390_v49, %v389_v48  ;;  %v1711_v48 = vpack.c.bf16 %v127_v47, %v126_v46  ;;  %v128_v49 = vld [vmem:[#allocation5 + $0x4a0] sm:$0xff] }
 0x2c6   :  { %v392_v51 = vrot.slane %v391_v50, 1 }
 0x2c8   :  { %v393_v52 = vadd.f32 %v392_v51, %v391_v50  ;;  %v129_v50 = vld [vmem:[#allocation5 + $0x4b0] sm:$0xff] }
 0x2c9   :  { %v1714_v51 = vpack.c.bf16 %v129_v50, %v128_v49  ;;  %v54_v49 = vld [vmem:[#allocation5 + $0xd0] sm:$0xff]  ;;  %v56_v50 = vld [vmem:[#allocation5 + $0xe0] sm:$0xff] }
 0x2ca   :  { %1493 = vmatmul.mubr.msk.f32.vlgmr.msra.gmra.mrb[4].mxu0 %vm228_vm4, %v393_v52  ;;  %v130_v52 = vld [vmem:[#allocation5 + $0x4c0] sm:$0xff]  ;;  %v1761_v53 = vpack.c.bf16 %v56_v50, %v54_v49 }
 0x2cb   :  { %1533 = vmatprep.mubr.msk.f32.mxu0 %vm1905_vm0, %v1904_v0  ;;  %1682 = vmatpush3.bf16.msra.mxu0 %v1681_v55  ;;  %v96_v50 = vld [vmem:[#allocation5 + $0x2a0] sm:$0xff] }
 0x2cc   :  { %1683 = vmatprep.subr.bf16.mxu0 %v1906_v1 }
 0x2cf   :  { %1685 = vmatpush3.bf16.msra.mxu0 %v1684_v8  ;;  %v1720_v8 = vpack.c.bf16 %v134_v7, %v133_v6  ;;  %v66_v6 = vld [vmem:[#allocation5 + $0x130] sm:$0xff]  ;;  %v68_v7 = vld [vmem:[#allocation5 + $0x140] sm:$0xff] }
 0x2d0   :  { %1686 = vmatprep.subr.bf16.mxu0 %v1906_v1 }
 0x2d3   :  { %1688 = vmatpush3.bf16.msra.mxu0 %v1687_v11 }
 0x2d4   :  { %1689 = vmatprep.subr.bf16.mxu0 %v1906_v1 }
 0x2d7   :  { %1691 = vmatpush3.bf16.msra.mxu0 %v1690_v14 }
 0x2d8   :  { %1692 = vmatprep.subr.bf16.mxu0 %v1906_v1 }
 0x2db   :  { %1694 = vmatpush3.bf16.msra.mxu0 %v1693_v17 }
 0x2dc   :  { %1722 = vmatprep.subr.bf16.mxu0 %v1906_v1 }
 0x39d   :  { %v463_v56 = vpop.f32.mrb[4].mxu0 }
 0x39e   :  { %v467_v57 = vmul.f32 0.0625, %v463_v56  ;;  %v1494_v58 = vpop.f32.mrb[5].mxu0 }
 0x3a0   :  { %v468_v59 = vadd.f32 1e-05, %v467_v57 }
 0x3a2   :  { %1824 = vrsqrt.f32 %v468_v59 }
 0x3ac   :  { %v1825_v60 = vpop.eup %1824 }
 0x3ad   :  { %v471_v61 = vrot.slane %v1825_v60, 7 }
 0x3af   :  { %v473_v62 = vmul.f32 %v471_v61, %v1977_v25 }
 0x3b1   :  { %v475_v63 = vrot.slane %v473_v62, 1 }
 0x3b3   :  { %v477_v2 = vmul.f32 %v475_v63, %v302_v39  ;;  %1502 = vmatmul.mubr.msk.f32.vlgmr.msra.gmra.mrb[2].mxu1 %vm303_vm6, %v475_v63  ;;  %v131_v63 = vld [vmem:[#allocation5 + $0x4d0] sm:$0xff] }
 0x3b4   :  { %1679 = vmatpush3.bf16.msra.mxu1 %v1968_v21  ;;  %1510 = vmatprep.mubr.msk.f32.mxu1 %vm1905_vm0, %v1904_v0  ;;  %v1696_v21 = vpack.c.bf16 %v117_v19, %v116_v18 }
 0x3b5   :  { %v479_v3 = vrot.slane %v477_v2, 6  ;;  %1508 = vmatprep.subr.mxu1 %v1904_v0  ;;  %v132_v2 = vld [vmem:[#allocation5 + $0x4e0] sm:$0xff] }
 0x3b7   :  { %v481_v4 = vsub.f32 %v1977_v25, %v479_v3 }
 0x3b8   :  { %1509 = vmatpush3.msk.msra.mxu1 %vm307_vm5, %v115_v37 }
 0x3b9   :  { %v555_v5 = vrot.slane %v481_v4, 2  ;;  %1695 = vmatprep.subr.bf16.mxu1 %v1906_v1  ;;  %v1717_v4 = vpack.c.bf16 %v132_v2, %v131_v63  ;;  %v64_v63 = vld [vmem:[#allocation5 + $0x120] sm:$0xff] }
 0x3bb   :  { %1511 = vmatmul.mubr.msk.f32.vlgmr.msra.gmra.mrb[4].mxu1 %vm303_vm6, %v555_v5 }
 0x3bc   :  { %1566 = vmatprep.mubr.msk.f32.mxu1 %vm1905_vm0, %v1904_v0  ;;  %1697 = vmatpush3.bf16.msra.mxu1 %v1696_v21 }
 0x3bd   :  { %1698 = vmatprep.subr.bf16.mxu1 %v1906_v1 }
 0x3c0   :  { %1700 = vmatpush3.bf16.msra.mxu1 %v1699_v26 }
 0x3c1   :  { %1701 = vmatprep.subr.bf16.mxu1 %v1906_v1 }
 0x3c4   :  { %1703 = vmatpush3.bf16.msra.mxu1 %v1702_v30 }
 0x3c5   :  { %1704 = vmatprep.subr.bf16.mxu1 %v1906_v1 }
 0x3c8   :  { %1706 = vmatpush3.bf16.msra.mxu1 %v1705_v33 }
 0x3c9   :  { %1707 = vmatprep.subr.bf16.mxu1 %v1906_v1 }
 0x486   :  { %v550_v34 = vpop.f32.mrb[2].mxu1 }
 0x487   :  { %v1503_v35 = vpop.f32.mrb[3].mxu1  ;;  %v631_v36 = vrot.slane %v550_v34, %v1975_v24 }
 0x489   :  { %v632_v38 = vmul.f32 %v631_v36, %v1981_v28  ;;  %v124_v28 = vld [vmem:[#allocation5 + $0x460] sm:$0xff] }
 0x48a   :  { %v1708_v45 = vpack.c.bf16 %v125_v44, %v124_v28  ;;  %v55_v28 = vld [vmem:[#allocation5 + $0xd8] sm:$0xff]  ;;  %v57_v44 = vld [vmem:[#allocation5 + $0xe8] sm:$0xff] }
 0x48c   :  { %1709 = vmatpush3.bf16.msra.mxu1 %v1708_v45 }
 0x48d   :  { %1710 = vmatprep.subr.bf16.mxu1 %v1906_v1 }
 0x48e   :  { %v624_v37 = vpop.f32.mrb[4].mxu1 }
 0x48f   :  { %v636_v39 = vrot.slane %v624_v37, %v1975_v24  ;;  %v1512_v40 = vpop.f32.mrb[5].mxu1 }
 0x490   :  { %1712 = vmatpush3.bf16.msra.mxu1 %v1711_v48  ;;  %v53_v40 = vld [vmem:[#allocation5 + $0xc8] sm:$0xff] }
 0x491   :  { %v637_v41 = vadd.f32 %v636_v39, %v632_v38  ;;  %1713 = vmatprep.subr.bf16.mxu1 %v1906_v1  ;;  %v51_v39 = vld [vmem:[#allocation5 + $0xb8] sm:$0xff] }
 0x492   :  { %v1755_v46 = vpack.c.bf16 %v53_v40, %v51_v39  ;;  %v88_v39 = vld [vmem:[#allocation5 + $0x220] sm:$0xff]  ;;  %v89_v40 = vld [vmem:[#allocation5 + $0x230] sm:$0xff] }
 0x493   :  { %v638_v42 = vmul.f32 0.01, %v637_v41 }
 0x494   :  { %1715 = vmatpush3.bf16.msra.mxu1 %v1714_v51 }
 0x495   :  { %v639_v43 = vmax.f32 %v637_v41, %v638_v42  ;;  %1564 = vmatprep.subr.mxu1 %v1904_v0  ;;  %v50_v42 = vld [vmem:[#allocation5 + $0xb0] sm:$0xff] }
 0x497   :  { %1534 = vmatmul.mubr.msk.f32.vlgmr.msra.gmra.mrb[6].mxu0 %vm228_vm4, %v639_v43  ;;  %v52_v43 = vld [vmem:[#allocation5 + $0xc0] sm:$0xff] }
 0x498   :  { %1724 = vmatpush3.bf16.msra.mxu0 %v1696_v21  ;;  %1612 = vmatprep.mubr.msk.f32.mxu0 %vm1905_vm0, %v1904_v0  ;;  %v1757_v47 = vpack.c.bf16 %v52_v43, %v50_v42  ;;  %v90_v42 = vld [vmem:[#allocation5 + $0x240] sm:$0xff]  ;;  %v91_v43 = vld [vmem:[#allocation5 + $0x250] sm:$0xff] }
 0x499   :  { %1725 = vmatprep.subr.bf16.mxu0 %v1906_v1  ;;  %1565 = vmatpush3.msra.mxu1 %v130_v52 }
 0x49a   :  { %1716 = vmatprep.subr.bf16.mxu1 %v1906_v1 }
 0x49c   :  { %1727 = vmatpush3.bf16.msra.mxu0 %v1699_v26 }
 0x49d   :  { %1728 = vmatprep.subr.bf16.mxu0 %v1906_v1 }
 0x4a0   :  { %1730 = vmatpush3.bf16.msra.mxu0 %v1702_v30 }
 0x4a1   :  { %1731 = vmatprep.subr.bf16.mxu0 %v1906_v1 }
 0x4a4   :  { %1733 = vmatpush3.bf16.msra.mxu0 %v1705_v33 }
 0x4a5   :  { %1734 = vmatprep.subr.bf16.mxu0 %v1906_v1 }
 0x4a8   :  { %1736 = vmatpush3.bf16.msra.mxu0 %v1708_v45 }
 0x4a9   :  { %1737 = vmatprep.subr.bf16.mxu0 %v1906_v1 }
 0x4ac   :  { %1739 = vmatpush3.bf16.msra.mxu0 %v1711_v48  ;;  %v1759_v48 = vpack.c.bf16 %v57_v44, %v55_v28  ;;  %v1799_v28 = vpack.c.bf16 %v91_v43, %v90_v42  ;;  %v92_v44 = vld [vmem:[#allocation5 + $0x260] sm:$0xff] }
 0x4ad   :  { %1740 = vmatprep.subr.bf16.mxu0 %v1906_v1 }
 0x4b0   :  { %1742 = vmatpush3.bf16.msra.mxu0 %v1714_v51  ;;  %v59_v51 = vld [vmem:[#allocation5 + $0xf8] sm:$0xff] }
 0x4b1   :  { %1610 = vmatprep.subr.mxu0 %v1904_v0 }
 0x4b4   :  { %1611 = vmatpush3.msra.mxu0 %v130_v52  ;;  %v61_v52 = vld [vmem:[#allocation5 + $0x108] sm:$0xff] }
 0x4b5   :  { %1783 = vmatprep.subr.bf16.mxu0 %v1906_v1 }
 0x56a   :  { %v713_v55 = vpop.f32.mrb[6].mxu0 }
 0x56b   :  { %v2049_v56 = vadd.f32 %v713_v55, %v643_v54  ;;  %v1535_v57 = vpop.f32.mrb[7].mxu0  ;;  %v1763_v54 = vpack.c.bf16 %v61_v52, %v59_v51  ;;  %v58_v55 = vld [vmem:[#allocation5 + $0xf0] sm:$0xff] }
 0x56c   :  { %v60_v57 = vld [vmem:[#allocation5 + $0x100] sm:$0xff]  ;;  %v97_v51 = vld [vmem:[#allocation5 + $0x2b0] sm:$0xff] }
 0x56d   :  { %v718_v58 = vsel %vm717_vm7, %v2049_v56, 0.0  ;;  %v1808_v52 = vpack.c.bf16 %v97_v51, %v96_v50 }
 0x56e   :  { %v719_v59 = vrot.slane %v718_v58, 4 }
 0x570   :  { %v720_v60 = vadd.f32 %v719_v59, %v718_v58  ;;  %v1765_v58 = vpack.c.bf16 %v60_v57, %v58_v55  ;;  %v63_v59 = vld [vmem:[#allocation5 + $0x118] sm:$0xff] }
 0x572   :  { %v721_v61 = vrot.slane %v720_v60, 2 }
 0x574   :  { %v722_v62 = vadd.f32 %v721_v61, %v720_v60  ;;  %v65_v60 = vld [vmem:[#allocation5 + $0x128] sm:$0xff] }
 0x575   :  { %v1767_v61 = vpack.c.bf16 %v65_v60, %v63_v59 }
 0x576   :  { %v723_v3 = vrot.slane %v722_v62, 1 }
 0x578   :  { %v724_v5 = vadd.f32 %v723_v3, %v722_v62  ;;  %v62_v62 = vld [vmem:[#allocation5 + $0x110] sm:$0xff]  ;;  %v67_v3 = vld [vmem:[#allocation5 + $0x138] sm:$0xff] }
 0x579   :  { %v1769_v2 = vpack.c.bf16 %v64_v63, %v62_v62 }
 0x57a   :  { %1567 = vmatmul.mubr.msk.f32.vlgmr.msra.gmra.mrb[6].mxu1 %vm725_vm8, %v724_v5 }
 0x57b   :  { %1718 = vmatpush3.bf16.msra.mxu1 %v1717_v4  ;;  %1579 = vmatprep.mubr.msk.f32.mxu1 %vm1905_vm0, %v1904_v0 }
 0x57c   :  { %1719 = vmatprep.subr.bf16.mxu1 %v1906_v1 }
 0x57f   :  { %1721 = vmatpush3.bf16.msra.mxu1 %v1720_v8 }
 0x580   :  { %1577 = vmatprep.subr.mxu1 %v1904_v0 }
 0x583   :  { %1578 = vmatpush3.msra.mxu1 %v135_v9 }
 0x584   :  { %1743 = vmatprep.subr.bf16.mxu1 %v1906_v1 }
 0x64d   :  { %v795_v10 = vpop.f32.mrb[6].mxu1 }
 0x64e   :  { %v799_v11 = vmul.f32 0.083333336, %v795_v10  ;;  %v1568_v12 = vpop.f32.mrb[7].mxu1  ;;  %v73_v10 = vld [vmem:[#allocation5 + $0x168] sm:$0xff] }
 0x64f   :  { %v70_v12 = vld [vmem:[#allocation5 + $0x150] sm:$0xff] }
 0x650   :  { %1580 = vmatmul.mubr.msk.f32.vlgmr.msra.gmra.mrb[8].mxu1 %vm800_vm9, %v799_v11 }
 0x651   :  { %1745 = vmatpush3.bf16.msra.mxu1 %v1717_v4  ;;  %1625 = vmatprep.mubr.msk.f32.mxu1 %vm1905_vm0, %v1904_v0 }
 0x652   :  { %1746 = vmatprep.subr.bf16.mxu1 %v1906_v1 }
 0x655   :  { %1748 = vmatpush3.bf16.msra.mxu1 %v1720_v8 }
 0x656   :  { %1623 = vmatprep.subr.mxu1 %v1904_v0 }
 0x659   :  { %1624 = vmatpush3.msra.mxu1 %v135_v9 }
 0x65a   :  { %1749 = vmatprep.subr.bf16.mxu1 %v1906_v1 }
 0x723   :  { %v870_v13 = vpop.f32.mrb[8].mxu1 }
 0x724   :  { %v877_v14 = vrot.slane %v870_v13, %v1975_v24  ;;  %v1581_v15 = vpop.f32.mrb[9].mxu1  ;;  %v72_v13 = vld [vmem:[#allocation5 + $0x160] sm:$0xff] }
 0x725   :  { %v75_v15 = vld [vmem:[#allocation5 + $0x178] sm:$0xff] }
 0x726   :  { %v878_v16 = vsub.f32 %v2049_v56, %v877_v14  ;;  %v1777_v14 = vpack.c.bf16 %v72_v13, %v70_v12 }
 0x728   :  { %v879_v17 = vmul.f32 %v878_v16, %v878_v16  ;;  %v77_v16 = vld [vmem:[#allocation5 + $0x188] sm:$0xff] }
 0x72a   :  { %v880_v18 = vsel %vm717_vm7, %v879_v17, 0.0  ;;  %v1779_v17 = vpack.c.bf16 %v77_v16, %v75_v15 }
 0x72b   :  { %v881_v19 = vrot.slane %v880_v18, 4 }
 0x72d   :  { %v882_v20 = vadd.f32 %v881_v19, %v880_v18  ;;  %v74_v18 = vld [vmem:[#allocation5 + $0x170] sm:$0xff]  ;;  %v76_v19 = vld [vmem:[#allocation5 + $0x180] sm:$0xff] }
 0x72f   :  { %v883_v21 = vrot.slane %v882_v20, 2 }
 0x731   :  { %v884_v22 = vadd.f32 %v883_v21, %v882_v20  ;;  %v1781_v20 = vpack.c.bf16 %v76_v19, %v74_v18  ;;  %v79_v21 = vld [vmem:[#allocation5 + $0x198] sm:$0xff] }
 0x733   :  { %v885_v26 = vrot.slane %v884_v22, 1 }
 0x735   :  { %v886_v27 = vadd.f32 %v885_v26, %v884_v22  ;;  %v78_v22 = vld [vmem:[#allocation5 + $0x190] sm:$0xff]  ;;  %v80_v26 = vld [vmem:[#allocation5 + $0x1a0] sm:$0xff] }
 0x737   :  { %1613 = vmatmul.mubr.msk.f32.vlgmr.msra.gmra.mrb[8].mxu0 %vm725_vm8, %v886_v27  ;;  %v81_v27 = vld [vmem:[#allocation5 + $0x1b0] sm:$0xff] }
 0x80a   :  { %v956_v29 = vpop.f32.mrb[8].mxu0 }
 0x80b   :  { %v960_v30 = vmul.f32 0.083333336, %v956_v29  ;;  %v1614_v31 = vpop.f32.mrb[9].mxu0  ;;  %v82_v29 = vld [vmem:[#allocation5 + $0x1c0] sm:$0xff] }
 0x80c   :  { %v83_v31 = vld [vmem:[#allocation5 + $0x1d0] sm:$0xff] }
 0x80d   :  { %v961_v32 = vadd.f32 1e-05, %v960_v30  ;;  %v1784_v30 = vpack.c.bf16 %v81_v27, %v80_v26 }
 0x80f   :  { %1826 = vrsqrt.f32 %v961_v32  ;;  %1785 = vmatpush1.bf16.msra.mxu0 %v1784_v30  ;;  %v1787_v32 = vpack.c.bf16 %v83_v31, %v82_v29 }
 0x810   :  { %1786 = vmatprep.subr.bf16.mxu0 %v1906_v1 }
 0x813   :  { %1788 = vmatpush1.bf16.msra.mxu0 %v1787_v32 }
 0x814   :  { %1789 = vmatprep.subr.bf16.mxu0 %v1906_v1 }
 0x819   :  { %v1827_v33 = vpop.eup %1826 }
 0x81a   :  { %v964_v34 = vrot.slane %v1827_v33, 4  ;;  %v84_v33 = vld [vmem:[#allocation5 + $0x1e0] sm:$0xff] }
 0x81c   :  { %v966_v35 = vmul.f32 %v964_v34, %v1977_v25  ;;  %v85_v34 = vld [vmem:[#allocation5 + $0x1f0] sm:$0xff] }
 0x81e   :  { %v968_v36 = vrot.slane %v966_v35, 4  ;;  %v1790_v35 = vpack.c.bf16 %v85_v34, %v84_v33 }
 0x820   :  { %v970_v37 = vmul.f32 %v968_v36, %v799_v11  ;;  %1626 = vmatmul.mubr.msk.f32.vlgmr.msra.gmra.mrb[10].mxu1 %vm800_vm9, %v968_v36  ;;  %v86_v36 = vld [vmem:[#allocation5 + $0x200] sm:$0xff]  ;;  %1791 = vmatpush1.bf16.msra.mxu0 %v1790_v35 }
 0x821   :  { %1751 = vmatpush3.bf16.msra.mxu1 %v1717_v4  ;;  %1638 = vmatprep.mubr.msk.f32.mxu1 %vm1905_vm0, %v1904_v0  ;;  %v69_v4 = vld [vmem:[#allocation5 + $0x148] sm:$0xff] }
 0x822   :  { %v972_v38 = vrot.slane %v970_v37, 3  ;;  %1752 = vmatprep.subr.bf16.mxu1 %v1906_v1  ;;  %v1771_v5 = vpack.c.bf16 %v69_v4, %v67_v3  ;;  %v87_v37 = vld [vmem:[#allocation5 + $0x210] sm:$0xff]  ;;  %1792 = vmatprep.subr.bf16.mxu0 %v1906_v1 }
 0x823   :  { %v99_v3 = vld [vmem:[#allocation5 + $0x2d0] sm:$0xff] }
 0x824   :  { %v974_v41 = vsub.f32 %v1977_v25, %v972_v38  ;;  %v1793_v38 = vpack.c.bf16 %v87_v37, %v86_v36 }
 0x825   :  { %1754 = vmatpush3.bf16.msra.mxu1 %v1720_v8  ;;  %v71_v8 = vld [vmem:[#allocation5 + $0x158] sm:$0xff] }
 0x826   :  { %v1048_v45 = vrot.slane %v974_v41, 5  ;;  %1636 = vmatprep.subr.mxu1 %v1904_v0  ;;  %v1775_v11 = vpack.c.bf16 %v73_v10, %v71_v8  ;;  %1794 = vmatpush1.bf16.msra.mxu0 %v1793_v38  ;;  %v1796_v41 = vpack.c.bf16 %v89_v40, %v88_v39  ;;  %v137_v8 = vld [vmem:[#allocation5 + $0x528] sm:$0xff] }
 0x827   :  { %1795 = vmatprep.subr.bf16.mxu0 %v1906_v1 }
 0x829   :  { %1637 = vmatpush3.msra.mxu1 %v135_v9  ;;  %v1773_v9 = vpack.c.bf16 %v68_v7, %v66_v6  ;;  %v101_v6 = vld [vmem:[#allocation5 + $0x2f0] sm:$0xff] }
 0x82a   :  { %1639 = vmatmul.mubr.msk.f32.vlgmr.msra.gmra.mrb[12].mxu1 %vm800_vm9, %v1048_v45  ;;  %1756 = vmatprep.subr.bf16.mxu1 %v1755_v46  ;;  %v93_v45 = vld [vmem:[#allocation5 + $0x270] sm:$0xff] }
 0x82b   :  { %1758 = vmatpush1.bf16.msra.mxu1 %v1757_v47  ;;  %1208 = vmatprep.mubr.f32.mxu1 %v1904_v0  ;;  %v1802_v46 = vpack.c.bf16 %v93_v45, %v92_v44  ;;  %v94_v47 = vld [vmem:[#allocation5 + $0x280] sm:$0xff] }
 0x82c   :  { %1760 = vmatprep.subr.bf16.mxu1 %v1759_v48  ;;  %1797 = vmatpush1.bf16.msra.mxu0 %v1796_v41  ;;  %v95_v48 = vld [vmem:[#allocation5 + $0x290] sm:$0xff] }
 0x82d   :  { %1798 = vmatprep.subr.bf16.mxu0 %v1906_v1  ;;  %v1805_v49 = vpack.c.bf16 %v95_v48, %v94_v47 }
 0x82f   :  { %1762 = vmatpush1.bf16.msra.mxu1 %v1761_v53 }
 0x830   :  { %1764 = vmatprep.subr.bf16.mxu1 %v1763_v54  ;;  %1800 = vmatpush1.bf16.msra.mxu0 %v1799_v28 }
 0x831   :  { %1801 = vmatprep.subr.bf16.mxu0 %v1906_v1 }
 0x833   :  { %1766 = vmatpush1.bf16.msra.mxu1 %v1765_v58 }
 0x834   :  { %1768 = vmatprep.subr.bf16.mxu1 %v1767_v61  ;;  %1803 = vmatpush1.bf16.msra.mxu0 %v1802_v46 }
 0x835   :  { %1804 = vmatprep.subr.bf16.mxu0 %v1906_v1 }
 0x837   :  { %1770 = vmatpush1.bf16.msra.mxu1 %v1769_v2  ;;  %v98_v2 = vld [vmem:[#allocation5 + $0x2c0] sm:$0xff] }
 0x838   :  { %1772 = vmatprep.subr.bf16.mxu1 %v1771_v5  ;;  %1806 = vmatpush1.bf16.msra.mxu0 %v1805_v49  ;;  %v1811_v4 = vpack.c.bf16 %v99_v3, %v98_v2  ;;  %v100_v5 = vld [vmem:[#allocation5 + $0x2e0] sm:$0xff] }
 0x839   :  { %1807 = vmatprep.subr.bf16.mxu0 %v1906_v1  ;;  %v1814_v7 = vpack.c.bf16 %v101_v6, %v100_v5 }
 0x83b   :  { %1774 = vmatpush1.bf16.msra.mxu1 %v1773_v9 }
 0x83c   :  { %1776 = vmatprep.subr.bf16.mxu1 %v1775_v11  ;;  %1809 = vmatpush1.bf16.msra.mxu0 %v1808_v52 }
 0x83d   :  { %1810 = vmatprep.subr.bf16.mxu0 %v1906_v1 }
 0x83f   :  { %1778 = vmatpush1.bf16.msra.mxu1 %v1777_v14 }
 0x840   :  { %1780 = vmatprep.subr.bf16.mxu1 %v1779_v17  ;;  %1812 = vmatpush1.bf16.msra.mxu0 %v1811_v4 }
 0x841   :  { %1813 = vmatprep.subr.bf16.mxu0 %v1906_v1 }
 0x843   :  { %1782 = vmatpush1.bf16.msra.mxu1 %v1781_v20 }
 0x844   :  { %1172 = vmatprep.subr.mxu1 %v79_v21  ;;  %1815 = vmatpush1.bf16.msra.mxu0 %v1814_v7 }
 0x845   :  { %1274 = vmatprep.subr.mxu0 %v1904_v0  ;;  %v1221_v0 = vsub.s32 7, %v1972_v23 }
 0x847   :  { %1173 = vmatpush1.msra.mxu1 %v78_v22  ;;  %v1222_v18 = vrot.slane %v1977_v25, %v1221_v0 }
 0x8f3   :  { %v1043_v53 = vpop.f32.mrb[10].mxu1 }
 0x8f4   :  { %v1627_v54 = vpop.f32.mrb[11].mxu1  ;;  %v1124_v55 = vrot.slane %v1043_v53, %v1975_v24 }
 0x8f6   :  { %v1125_v58 = vmul.f32 %v1124_v55, %v2049_v56  ;;  %v102_v56 = vld [vmem:[#allocation5 + $0x300] sm:$0xf] }
 0x8f7   :  { %1336 = vmatpush1.msk.msra.mxu0 %vm307_vm5, %v102_v56 }
 0x8fd   :  { %v1117_v57 = vpop.f32.mrb[12].mxu1 }
 0x8fe   :  { %v1129_v59 = vrot.slane %v1117_v57, %v1975_v24  ;;  %v1640_v60 = vpop.f32.mrb[13].mxu1  ;;  %v1135_v24 = vsub.s32 6, %v1972_v23 }
 0x900   :  { %v1130_v61 = vadd.f32 %v1129_v59, %v1125_v58  ;;  %v1136_v9 = vrot.slane %v1977_v25, %v1135_v24  ;;  %v1140_v10 = vrot.slane %v137_v8, %v1135_v24 }
 0x902   :  { %v1131_v62 = vmul.f32 0.01, %v1130_v61 }
 0x904   :  { %v1132_v63 = vmax.f32 %v1130_v61, %v1131_v62 }
 0x906   :  { %1335 = vmatmul.mubr.msk.f32.vlgmr.msra.gmra.mrb[14].mxu1 %vm725_vm8, %v1132_v63 }
 0x9d9   :  { %v1210_v11 = vpop.f32.mrb[14].mxu1 }
 0x9da   :  { %v1211_v12 = vadd.f32 %v1210_v11, %v1136_v9  ;;  %v1212_v13 = vpop.f32.mrb[15].mxu1 }
 0x9db   :  { %v1213_v14 = vadd.f32 %v1212_v13, %v1140_v10 }
 0x9dc   :  { %v1215_v1 = vmul.f32 0.01, %v1211_v12 }
 0x9dd   :  { %v1216_v15 = vmul.f32 0.01, %v1213_v14 }
 0x9de   :  { %v1217_v17 = vmax.f32 %v1211_v12, %v1215_v1 }
 0x9df   :  { %v1218_v16 = vmax.f32 %v1213_v14, %v1216_v15 }
 0x9e1   :  { %1337 = vmatprep.mubr.msk.f32.mxu0 %vm1223_vm10, %v1218_v16 }
 0x9e2   :  { %1295 = vmatmul.mubr.f32.vlgmr.msra.gmra.mrb[10].mxu0 %v1217_v17 }
 0xab5   :  { %v1296_v19 = vpop.f32.mrb[10].mxu0 }
 0xab6   :  { %v1297_v20 = vadd.f32 %v1296_v19, %v1222_v18  ;;  %v1298_v21 = vpop.f32.mrb[11].mxu0 }
 0xab8   :  { %v1300_v22 = vmul.f32 0.01, %v1297_v20 }
 0xaba   :  { %v1301_v26 = vmax.f32 %v1297_v20, %v1300_v22 }
 0xabc   :  { %1302 = vst [vmem:[#allocation7] sm:$0xf] %v1301_v26 }
 0xabd   :  { %1883 = shalt.err (!%p1880_p6)
}
 0xabe   :  { %s1884_s10 = scalar_lea.hbm %s2112_s2, 64 }
 0xabf   :  { %p1885_p7 = scmp.ne.s32.totalorder %s2112_s2, %s1884_s10  ;;  %p1888_p8 = scmp.lt.u32.totalorder %s1884_s10, %s2112_s2 }
 0xac1   :  { %p1890_p9 = pnand %p1888_p8, %p1885_p7 }
 0xac3   :  { %1893 = shalt.err (!%p1890_p9)
}
 0xac4   :  { %1312 = dma.vmem_to_hbm [thread:$0]  %s1310_s6, 64, %s2112_s2, [#allocation4]  }
 0xac5   :  { %1898 = dma.done.wait [#allocation4], 64  }
 0xac6   :  { %1899 = vsyncadd [#allocation4], 4294967232 }
 0xac7   :  { %1316 = vsyncpa [#allocation3], 1 }
 0xac8   :  { %1317 = vsyncpa [#allocation6], 1 }
 0xac9   :  { %1318 = vsyncpa [#allocation4], 1 }

</bundles_post_ra>
